<compile_context>
chip_gen: v7x
topology: tpu7x:2x2x1
jax: 0.10.0
libtpu: 0.0.40
codegen_flags: <defaults>
</compile_context>

<pallas_src>
import jax
import jax.numpy as jnp
import numpy as np
from jax.experimental import pallas as pl
from jax.experimental.pallas import tpu as pltpu

EPS = 1e-6
ALPHA = 0.1

_TARGET_BLOCK_BYTES = 4 * 1024 * 1024     # >= 1-2 MiB/step amortizes grid overhead
_MAX_SUBCHANNEL_UNROLL = 16               # cap on static per-step channel unroll
_MAX_WHOLE_ROW_CHANNELS = 64              # cap for the non-128-aligned H*W path


def _default_vmem_limit():
    # Per-generation scoped-VMEM budget: ~96 MiB on 128 MiB parts (v5e/v6e),
    # ~48 MiB on v7x (64 MiB physical); safe 48 MiB fallback if query fails.
    try:
        phys = pltpu.get_tpu_info().vmem_capacity_bytes
        return int(min(96 * 1024 * 1024,
                       max(32 * 1024 * 1024, phys - 16 * 1024 * 1024)))
    except Exception:
        return 48 * 1024 * 1024


_VMEM_LIMIT = _default_vmem_limit()


def _largest_divisor_at_most(n, cap):
    cap = int(max(1, min(n, cap)))
    for d in range(cap, 0, -1):
        if n % d == 0:
            return d
    return 1


def _spatial_tile(n, cap_elems):
    """Largest multiple-of-128 divisor of n that is <= cap_elems (else smallest)."""
    divs = [d for d in range(128, n + 1, 128) if n % d == 0]
    if not divs:
        return n
    fitting = [d for d in divs if d <= cap_elems]
    return max(fitting) if fitting else min(divs)


def _make_gram_kernel(batch, n_spatial, tc):
    """Phase 1: per-channel stats + partial Gram z = xn @ xn.T for one group."""
    inv_nm1 = 1.0 / float(n_spatial - 1)

    def kernel(x_ref, z_ref, mu_ref, sig_ref):
        # x_ref  : (B, tc * N)  native dtype, one group of tc channels
        # z_ref  : (1, B, B)    f32 per-core partial Gram (VMEM-resident over g)
        # mu_ref : (1, B, tc)   f32 per-(batch, channel) means of this group
        # sig_ref: (1, B, tc)   f32 per-(batch, channel) sigmas of this group
        @pl.when(pl.program_id(1) == 0)
        def _init():
            z_ref[...] = jnp.zeros_like(z_ref)

        # Hoisted once per step (not per sub-channel).
        row = jax.lax.broadcasted_iota(jnp.int32, (batch, batch), 0)
        col = jax.lax.broadcasted_iota(jnp.int32, (batch, batch), 1)
        eye = (row == col).astype(jnp.float32)

        for t in range(tc):                                    # static unroll
            x = x_ref[:, t * n_spatial:(t + 1) * n_spatial].astype(jnp.float32)
            mu = jnp.mean(x, axis=1, keepdims=True)            # (B, 1)
            diff = x - mu                                      # 1 full-tile VPU pass
            var = jnp.sum(diff * diff, axis=1, keepdims=True) * inv_nm1
            sig = jnp.sqrt(var + EPS)
            isig_c = jax.lax.rsqrt(var + EPS)                  # (B, 1)
            # Gram of the centered (not yet normalized) channel: f32 MXU
            # operands (no bf16 cast), contraction expressed natively.
            gram = jax.lax.dot_general(
                diff, diff, (((1,), (1,)), ((), ())),
                preferred_element_type=jnp.float32)            # (B, B)
            # Row-oriented 1/sigma straight from the Gram diagonal (avoids a
            # (B,1)->(1,B) transpose); only scales z, which feeds an argmin.
            diag_r = jnp.sum(gram * eye, axis=0, keepdims=True)   # (1, B)
            isig_r = jax.lax.rsqrt(diag_r * inv_nm1 + EPS)         # (1, B)
            z_ref[0, :, :] += gram * (isig_c * isig_r)
            mu_ref[0, :, t:t + 1] = mu
            sig_ref[0, :, t:t + 1] = sig

    return kernel


def _make_apply_kernel(tc, width):
    """Phase 2: pure per-channel affine map out = x * scale + bias."""
    def kernel(scale_ref, bias_ref, x_ref, o_ref):
        # scale_ref/bias_ref: (1, B, tc) f32 ; x_ref/o_ref: (B, tc*width) data
        for t in range(tc):                                    # static unroll
            sc = scale_ref[0, :, t:t + 1]                      # (B, 1)
            bi = bias_ref[0, :, t:t + 1]                       # (B, 1)
            xs = x_ref[:, t * width:(t + 1) * width].astype(jnp.float32)
            o_ref[:, t * width:(t + 1) * width] = (xs * sc + bi).astype(o_ref.dtype)

    return kernel


@jax.jit
def fusestyle(x_nchw, lmda):
    """x_nchw: (B, C, H, W); lmda: (B, 1) (or (B,1,1,1)).  Mix always applied."""
    B, C, H, W = x_nchw.shape
    N = H * W
    if N <= 1:
        raise ValueError("FuseStyle needs H*W > 1 (unbiased variance).")

    in_dtype = x_nchw.dtype
    itemsize = x_nchw.dtype.itemsize
    chan_bytes = B * N * itemsize
    lane_aligned = (N % 128 == 0)

    # ---- static tiling decisions --------------------------------------------
    if lane_aligned:
        cap = min(_MAX_SUBCHANNEL_UNROLL, _TARGET_BLOCK_BYTES // max(chan_bytes, 1))
        tc1 = _largest_divisor_at_most(C, cap)
    else:
        # Non-128-aligned H*W is only legal as whole-row blocks (last block dim
        # equals the full C*H*W extent).
        if C > _MAX_WHOLE_ROW_CHANNELS or C * chan_bytes > 8 * 1024 * 1024:
            # TODO(synk): masked-stat spatial padding / in-kernel fori_loop over
            # sub-channels for large feature maps with H*W % 128 != 0.
            raise NotImplementedError(
                "H*W must be a multiple of 128 unless the whole (B, C*H*W) row "
                "fits a single block.")
        tc1 = C
    g1 = C // tc1
    ncores = 2 if (g1 >= 2 and g1 % 2 == 0) else 1   # per-core partial Grams (v7x)
    gpc = g1 // ncores

    if not lane_aligned:
        tc2, ts = C, N
    elif chan_bytes <= _TARGET_BLOCK_BYTES:
        cap = min(_MAX_SUBCHANNEL_UNROLL, _TARGET_BLOCK_BYTES // max(chan_bytes, 1))
        tc2 = _largest_divisor_at_most(C, cap)
        ts = N
    else:
        # Big channels: phase 2 is pure elementwise now, so tile the spatial axis.
        tc2 = 1
        ts = _spatial_tile(N, _TARGET_BLOCK_BYTES // max(B * itemsize, 1))
    g2 = C // tc2
    s2 = (N // ts) if tc2 == 1 else 1

    x2 = x_nchw.reshape(B, C * N)                     # native dtype; view
    lam = lmda.astype(jnp.float32).reshape(B, 1)

    # ---- phase 1: per-channel stats + Gram ----------------------------------
    z_parts, mu_parts, sig_parts = pl.pallas_call(
        _make_gram_kernel(B, N, tc1),
        grid=(ncores, gpc),
        in_specs=[pl.BlockSpec((B, tc1 * N), lambda p, g: (0, p * gpc + g))],
        out_specs=[
            pl.BlockSpec((1, B, B), lambda p, g: (p, 0, 0)),
            pl.BlockSpec((1, B, tc1), lambda p, g: (p * gpc + g, 0, 0)),
            pl.BlockSpec((1, B, tc1), lambda p, g: (p * gpc + g, 0, 0)),
        ],
        out_shape=[
            jax.ShapeDtypeStruct((ncores, B, B), jnp.float32),
            jax.ShapeDtypeStruct((g1, B, tc1), jnp.float32),
            jax.ShapeDtypeStruct((g1, B, tc1), jnp.float32),
        ],
        compiler_params=pltpu.CompilerParams(
            dimension_semantics=("parallel", "arbitrary"),
            vmem_limit_bytes=_VMEM_LIMIT),
    )(x2)

    # ---- O(B^2 + B*C) glue in plain JAX --------------------------------------
    z = jnp.sum(z_parts, axis=0)                                # (B, B)
    mu = mu_parts.transpose(1, 0, 2).reshape(B, C)              # (B, C)
    sig = sig_parts.transpose(1, 0, 2).reshape(B, C)            # (B, C)
    perm = jnp.argmin(z, axis=0)                                # true column argmin
    mu2, sig2 = mu[perm], sig[perm]
    mu_mix = mu * lam + mu2 * (1.0 - lam)
    sig_mix = sig * lam + sig2 * (1.0 - lam)
    scale = sig_mix / sig                                       # tiny exact divide
    bias = mu_mix - mu * scale
    # Shape coefficients so each phase-2 grid step gets its own (1, B, tc2) slab.
    scale3 = scale.reshape(B, g2, tc2).transpose(1, 0, 2)
    bias3 = bias.reshape(B, g2, tc2).transpose(1, 0, 2)

    # ---- phase 2: per-channel affine map, channel-group x spatial tiling -----
    out2 = pl.pallas_call(
        _make_apply_kernel(tc2, ts),
        grid=(g2, s2),
        in_specs=[
            pl.BlockSpec((1, B, tc2), lambda g, s: (g, 0, 0)),
            pl.BlockSpec((1, B, tc2), lambda g, s: (g, 0, 0)),
            pl.BlockSpec((B, tc2 * ts), lambda g, s: (0, g * s2 + s)),
        ],
        out_specs=pl.BlockSpec((B, tc2 * ts), lambda g, s: (0, g * s2 + s)),
        out_shape=jax.ShapeDtypeStruct((B, C * N), in_dtype),
        compiler_params=pltpu.CompilerParams(
            dimension_semantics=("parallel", "parallel"),
            vmem_limit_bytes=_VMEM_LIMIT),
    )(scale3, bias3, x2)
    return out2.reshape(B, C, H, W)


def fusestyle_reference(x, lmda):
    """Pure-JAX reference mirroring the PyTorch forward (mix always applied)."""
    B, C, H, W = x.shape
    mu = jnp.mean(x, axis=(2, 3), keepdims=True)
    var = jnp.var(x, axis=(2, 3), keepdims=True, ddof=1)
    sig = jnp.sqrt(var + EPS)
    xn = (x - mu) / sig
    y = xn.reshape(B, -1)
    z = y @ y.T
    perm = jnp.argmin(z, axis=0)
    lm = lmda.reshape(B, 1, 1, 1)
    mu2, sig2 = mu[perm], sig[perm]
    mu_mix = mu * lm + mu2 * (1.0 - lm)
    sig_mix = sig * lm + sig2 * (1.0 - lm)
    return xn * sig_mix + mu_mix


if __name__ == "__main__":
    key = jax.random.PRNGKey(0)
    kx, kl = jax.random.split(key)
    B, C, H, W = 2, 4, 16, 16
    x = jax.random.normal(kx, (B, C, H, W), dtype=jnp.float32) * 2.0 + 0.5
    # Beta(alpha, alpha) sample; (B, 1, 1, 1) in torch -> (B, 1) here.
    lmda = jax.random.beta(kl, ALPHA, ALPHA, shape=(B, 1)).astype(jnp.float32)

    out = fusestyle(x, lmda)
    out = jax.block_until_ready(out)

    ref = fusestyle_reference(x, lmda)
    np.testing.assert_allclose(np.asarray(out), np.asarray(ref),
                               rtol=1e-4, atol=1e-4)
    print("KERNEL_OK")
</pallas_src>

<mosaic_0001>
module attributes {stable_mosaic.version = 11 : i64} {
  func.func @kernel(%arg0: i32, %arg1: i32, %arg2: memref<2x1024xf32, #tpu.memory_space<vmem>>, %arg3: memref<1x2x2xf32, #tpu.memory_space<vmem>>, %arg4: memref<1x2x4xf32, #tpu.memory_space<vmem>>, %arg5: memref<1x2x4xf32, #tpu.memory_space<vmem>>) attributes {dimension_semantics = [#tpu.dimension_semantics<parallel>, #tpu.dimension_semantics<arbitrary>], iteration_bounds = array<i64: 1, 1>, scalar_prefetch = 0 : i64, scratch_operands = 0 : i64, tpu.core_type = #tpu.core_type<tc>, window_params = [{transform_indices = @transform_0, window_bounds = array<i64: 2, 1024>}, {transform_indices = @transform_1, window_bounds = array<i64: 1, 2, 2>}, {transform_indices = @transform_2, window_bounds = array<i64: 1, 2, 4>}, {transform_indices = @transform_3, window_bounds = array<i64: 1, 2, 4>}]} {
    %c0_i32 = arith.constant 0 : i32
    %0 = arith.cmpi eq, %arg1, %c0_i32 : i32
    %1 = arith.extui %0 : i1 to i32
    %c0_i32_0 = arith.constant 0 : i32
    %2 = arith.cmpi ne, %1, %c0_i32_0 : i32
    scf.if %2 {
      %cst_89 = arith.constant 0.000000e+00 : f32
      %180 = vector.broadcast %cst_89 : f32 to vector<1x2x2xf32>
      %c0_90 = arith.constant 0 : index
      %c0_91 = arith.constant 0 : index
      %c0_92 = arith.constant 0 : index
      %181 = vector.load %arg3[%c0_90, %c0_91, %c0_92] : memref<1x2x2xf32, #tpu.memory_space<vmem>>, vector<1x2x2xf32>
      tpu.vector_store %arg3[%c0_90, %c0_91, %c0_92], %180 {strides = array<i32>} : memref<1x2x2xf32, #tpu.memory_space<vmem>>, vector<1x2x2xf32>,
    } else {
    }
    %3 = tpu.iota {dimensions = array<i32: 0>} : vector<2x2xi32>
    %4 = tpu.iota {dimensions = array<i32: 1>} : vector<2x2xi32>
    %5 = arith.cmpi eq, %3, %4 : vector<2x2xi32>
    %6 = arith.extui %5 : vector<2x2xi1> to vector<2x2xi32>
    %7 = arith.sitofp %6 : vector<2x2xi32> to vector<2x2xf32>
    %c0 = arith.constant 0 : index
    %c0_1 = arith.constant 0 : index
    %8 = vector.load %arg2[%c0, %c0_1] : memref<2x1024xf32, #tpu.memory_space<vmem>>, vector<2x256xf32>
    %cst = arith.constant dense<0.000000e+00> : vector<2xf32>
    %9 = vector.multi_reduction <add>, %8, %cst [1] : vector<2x256xf32> to vector<2xf32>
    %10 = vector.shape_cast %9 : vector<2xf32> to vector<2x1xf32>
    %cst_2 = arith.constant 2.560000e+02 : f32
    %11 = vector.broadcast %cst_2 : f32 to vector<2x1xf32>
    %12 = arith.divf %10, %11 : vector<2x1xf32>
    %13 = vector.broadcast %12 : vector<2x1xf32> to vector<2x256xf32>
    %14 = arith.subf %8, %13 : vector<2x256xf32>
    %15 = arith.mulf %14, %14 : vector<2x256xf32>
    %cst_3 = arith.constant dense<0.000000e+00> : vector<2xf32>
    %16 = vector.multi_reduction <add>, %15, %cst_3 [1] : vector<2x256xf32> to vector<2xf32>
    %17 = vector.shape_cast %16 : vector<2xf32> to vector<2x1xf32>
    %cst_4 = arith.constant 0.00392156886 : f32
    %18 = vector.broadcast %cst_4 : f32 to vector<2x1xf32>
    %19 = arith.mulf %17, %18 : vector<2x1xf32>
    %cst_5 = arith.constant 9.99999997E-7 : f32
    %20 = vector.broadcast %cst_5 : f32 to vector<2x1xf32>
    %21 = arith.addf %19, %20 : vector<2x1xf32>
    %22 = math.sqrt %21 : vector<2x1xf32>
    %cst_6 = arith.constant 9.99999997E-7 : f32
    %23 = vector.broadcast %cst_6 : f32 to vector<2x1xf32>
    %24 = arith.addf %19, %23 : vector<2x1xf32>
    %25 = math.rsqrt %24 : vector<2x1xf32>
    %cst_7 = arith.constant dense<0.000000e+00> : vector<2x2xf32>
    %26 = tpu.matmul %14, %14, %cst_7 {dimension_numbers = #tpu.dot_dimension_numbers<[1], [1], [0], [0], [0, 0, 1, 0], [], []>} : vector<2x256xf32>, vector<2x256xf32>, vector<2x2xf32> -> vector<2x2xf32>
    %27 = arith.mulf %26, %7 : vector<2x2xf32>
    %cst_8 = arith.constant dense<0.000000e+00> : vector<2xf32>
    %28 = vector.multi_reduction <add>, %27, %cst_8 [0] : vector<2x2xf32> to vector<2xf32>
    %29 = vector.shape_cast %28 : vector<2xf32> to vector<1x2xf32>
    %cst_9 = arith.constant 0.00392156886 : f32
    %30 = vector.broadcast %cst_9 : f32 to vector<1x2xf32>
    %31 = arith.mulf %29, %30 : vector<1x2xf32>
    %cst_10 = arith.constant 9.99999997E-7 : f32
    %32 = vector.broadcast %cst_10 : f32 to vector<1x2xf32>
    %33 = arith.addf %31, %32 : vector<1x2xf32>
    %34 = math.rsqrt %33 : vector<1x2xf32>
    %c0_11 = arith.constant 0 : index
    %c0_12 = arith.constant 0 : index
    %c0_13 = arith.constant 0 : index
    %35 = vector.load %arg3[%c0_11, %c0_12, %c0_13] : memref<1x2x2xf32, #tpu.memory_space<vmem>>, vector<1x2x2xf32>
    %36 = vector.shape_cast %35 : vector<1x2x2xf32> to vector<2x2xf32>
    %37 = vector.broadcast %25 : vector<2x1xf32> to vector<2x2xf32>
    %38 = vector.broadcast %34 : vector<1x2xf32> to vector<2x2xf32>
    %39 = arith.mulf %37, %38 : vector<2x2xf32>
    %40 = arith.mulf %26, %39 : vector<2x2xf32>
    %41 = arith.addf %36, %40 : vector<2x2xf32>
    %c0_14 = arith.constant 0 : index
    %c0_15 = arith.constant 0 : index
    %c0_16 = arith.constant 0 : index
    %42 = vector.load %arg3[%c0_14, %c0_15, %c0_16] : memref<1x2x2xf32, #tpu.memory_space<vmem>>, vector<1x2x2xf32>
    %43 = vector.shape_cast %42 : vector<1x2x2xf32> to vector<2x2xf32>
    %44 = vector.shape_cast %41 : vector<2x2xf32> to vector<1x2x2xf32>
    tpu.vector_store %arg3[%c0_14, %c0_15, %c0_16], %44 {strides = array<i32>} : memref<1x2x2xf32, #tpu.memory_space<vmem>>, vector<1x2x2xf32>,
    %c0_17 = arith.constant 0 : index
    %c0_18 = arith.constant 0 : index
    %c0_19 = arith.constant 0 : index
    %45 = vector.load %arg4[%c0_17, %c0_18, %c0_19] : memref<1x2x4xf32, #tpu.memory_space<vmem>>, vector<1x2x1xf32>
    %46 = vector.shape_cast %45 : vector<1x2x1xf32> to vector<2x1xf32>
    %47 = vector.shape_cast %12 : vector<2x1xf32> to vector<1x2x1xf32>
    tpu.vector_store %arg4[%c0_17, %c0_18, %c0_19], %47 {strides = array<i32>} : memref<1x2x4xf32, #tpu.memory_space<vmem>>, vector<1x2x1xf32>,
    %c0_20 = arith.constant 0 : index
    %c0_21 = arith.constant 0 : index
    %c0_22 = arith.constant 0 : index
    %48 = vector.load %arg5[%c0_20, %c0_21, %c0_22] : memref<1x2x4xf32, #tpu.memory_space<vmem>>, vector<1x2x1xf32>
    %49 = vector.shape_cast %48 : vector<1x2x1xf32> to vector<2x1xf32>
    %50 = vector.shape_cast %22 : vector<2x1xf32> to vector<1x2x1xf32>
    tpu.vector_store %arg5[%c0_20, %c0_21, %c0_22], %50 {strides = array<i32>} : memref<1x2x4xf32, #tpu.memory_space<vmem>>, vector<1x2x1xf32>,
    %c0_23 = arith.constant 0 : index
    %c256 = arith.constant 256 : index
    %51 = vector.load %arg2[%c0_23, %c256] : memref<2x1024xf32, #tpu.memory_space<vmem>>, vector<2x256xf32>
    %cst_24 = arith.constant dense<0.000000e+00> : vector<2xf32>
    %52 = vector.multi_reduction <add>, %51, %cst_24 [1] : vector<2x256xf32> to vector<2xf32>
    %53 = vector.shape_cast %52 : vector<2xf32> to vector<2x1xf32>
    %cst_25 = arith.constant 2.560000e+02 : f32
    %54 = vector.broadcast %cst_25 : f32 to vector<2x1xf32>
    %55 = arith.divf %53, %54 : vector<2x1xf32>
    %56 = vector.broadcast %55 : vector<2x1xf32> to vector<2x256xf32>
    %57 = arith.subf %51, %56 : vector<2x256xf32>
    %58 = arith.mulf %57, %57 : vector<2x256xf32>
    %cst_26 = arith.constant dense<0.000000e+00> : vector<2xf32>
    %59 = vector.multi_reduction <add>, %58, %cst_26 [1] : vector<2x256xf32> to vector<2xf32>
    %60 = vector.shape_cast %59 : vector<2xf32> to vector<2x1xf32>
    %cst_27 = arith.constant 0.00392156886 : f32
    %61 = vector.broadcast %cst_27 : f32 to vector<2x1xf32>
    %62 = arith.mulf %60, %61 : vector<2x1xf32>
    %cst_28 = arith.constant 9.99999997E-7 : f32
    %63 = vector.broadcast %cst_28 : f32 to vector<2x1xf32>
    %64 = arith.addf %62, %63 : vector<2x1xf32>
    %65 = math.sqrt %64 : vector<2x1xf32>
    %cst_29 = arith.constant 9.99999997E-7 : f32
    %66 = vector.broadcast %cst_29 : f32 to vector<2x1xf32>
    %67 = arith.addf %62, %66 : vector<2x1xf32>
    %68 = math.rsqrt %67 : vector<2x1xf32>
    %cst_30 = arith.constant dense<0.000000e+00> : vector<2x2xf32>
    %69 = tpu.matmul %57, %57, %cst_30 {dimension_numbers = #tpu.dot_dimension_numbers<[1], [1], [0], [0], [0, 0, 1, 0], [], []>} : vector<2x256xf32>, vector<2x256xf32>, vector<2x2xf32> -> vector<2x2xf32>
    %70 = arith.mulf %69, %7 : vector<2x2xf32>
    %cst_31 = arith.constant dense<0.000000e+00> : vector<2xf32>
    %71 = vector.multi_reduction <add>, %70, %cst_31 [0] : vector<2x2xf32> to vector<2xf32>
    %72 = vector.shape_cast %71 : vector<2xf32> to vector<1x2xf32>
    %cst_32 = arith.constant 0.00392156886 : f32
    %73 = vector.broadcast %cst_32 : f32 to vector<1x2xf32>
    %74 = arith.mulf %72, %73 : vector<1x2xf32>
    %cst_33 = arith.constant 9.99999997E-7 : f32
    %75 = vector.broadcast %cst_33 : f32 to vector<1x2xf32>
    %76 = arith.addf %74, %75 : vector<1x2xf32>
    %77 = math.rsqrt %76 : vector<1x2xf32>
    %c0_34 = arith.constant 0 : index
    %c0_35 = arith.constant 0 : index
    %c0_36 = arith.constant 0 : index
    %78 = vector.load %arg3[%c0_34, %c0_35, %c0_36] : memref<1x2x2xf32, #tpu.memory_space<vmem>>, vector<1x2x2xf32>
    %79 = vector.shape_cast %78 : vector<1x2x2xf32> to vector<2x2xf32>
    %80 = vector.broadcast %68 : vector<2x1xf32> to vector<2x2xf32>
    %81 = vector.broadcast %77 : vector<1x2xf32> to vector<2x2xf32>
    %82 = arith.mulf %80, %81 : vector<2x2xf32>
    %83 = arith.mulf %69, %82 : vector<2x2xf32>
    %84 = arith.addf %79, %83 : vector<2x2xf32>
    %c0_37 = arith.constant 0 : index
    %c0_38 = arith.constant 0 : index
    %c0_39 = arith.constant 0 : index
    %85 = vector.load %arg3[%c0_37, %c0_38, %c0_39] : memref<1x2x2xf32, #tpu.memory_space<vmem>>, vector<1x2x2xf32>
    %86 = vector.shape_cast %85 : vector<1x2x2xf32> to vector<2x2xf32>
    %87 = vector.shape_cast %84 : vector<2x2xf32> to vector<1x2x2xf32>
    tpu.vector_store %arg3[%c0_37, %c0_38, %c0_39], %87 {strides = array<i32>} : memref<1x2x2xf32, #tpu.memory_space<vmem>>, vector<1x2x2xf32>,
    %c0_40 = arith.constant 0 : index
    %c0_41 = arith.constant 0 : index
    %c1 = arith.constant 1 : index
    %88 = vector.load %arg4[%c0_40, %c0_41, %c1] : memref<1x2x4xf32, #tpu.memory_space<vmem>>, vector<1x2x1xf32>
    %89 = vector.shape_cast %88 : vector<1x2x1xf32> to vector<2x1xf32>
    %90 = vector.shape_cast %55 : vector<2x1xf32> to vector<1x2x1xf32>
    tpu.vector_store %arg4[%c0_40, %c0_41, %c1], %90 {strides = array<i32>} : memref<1x2x4xf32, #tpu.memory_space<vmem>>, vector<1x2x1xf32>,
    %c0_42 = arith.constant 0 : index
    %c0_43 = arith.constant 0 : index
    %c1_44 = arith.constant 1 : index
    %91 = vector.load %arg5[%c0_42, %c0_43, %c1_44] : memref<1x2x4xf32, #tpu.memory_space<vmem>>, vector<1x2x1xf32>
    %92 = vector.shape_cast %91 : vector<1x2x1xf32> to vector<2x1xf32>
    %93 = vector.shape_cast %65 : vector<2x1xf32> to vector<1x2x1xf32>
    tpu.vector_store %arg5[%c0_42, %c0_43, %c1_44], %93 {strides = array<i32>} : memref<1x2x4xf32, #tpu.memory_space<vmem>>, vector<1x2x1xf32>,
    %c0_45 = arith.constant 0 : index
    %c512 = arith.constant 512 : index
    %94 = vector.load %arg2[%c0_45, %c512] : memref<2x1024xf32, #tpu.memory_space<vmem>>, vector<2x256xf32>
    %cst_46 = arith.constant dense<0.000000e+00> : vector<2xf32>
    %95 = vector.multi_reduction <add>, %94, %cst_46 [1] : vector<2x256xf32> to vector<2xf32>
    %96 = vector.shape_cast %95 : vector<2xf32> to vector<2x1xf32>
    %cst_47 = arith.constant 2.560000e+02 : f32
    %97 = vector.broadcast %cst_47 : f32 to vector<2x1xf32>
    %98 = arith.divf %96, %97 : vector<2x1xf32>
    %99 = vector.broadcast %98 : vector<2x1xf32> to vector<2x256xf32>
    %100 = arith.subf %94, %99 : vector<2x256xf32>
    %101 = arith.mulf %100, %100 : vector<2x256xf32>
    %cst_48 = arith.constant dense<0.000000e+00> : vector<2xf32>
    %102 = vector.multi_reduction <add>, %101, %cst_48 [1] : vector<2x256xf32> to vector<2xf32>
    %103 = vector.shape_cast %102 : vector<2xf32> to vector<2x1xf32>
    %cst_49 = arith.constant 0.00392156886 : f32
    %104 = vector.broadcast %cst_49 : f32 to vector<2x1xf32>
    %105 = arith.mulf %103, %104 : vector<2x1xf32>
    %cst_50 = arith.constant 9.99999997E-7 : f32
    %106 = vector.broadcast %cst_50 : f32 to vector<2x1xf32>
    %107 = arith.addf %105, %106 : vector<2x1xf32>
    %108 = math.sqrt %107 : vector<2x1xf32>
    %cst_51 = arith.constant 9.99999997E-7 : f32
    %109 = vector.broadcast %cst_51 : f32 to vector<2x1xf32>
    %110 = arith.addf %105, %109 : vector<2x1xf32>
    %111 = math.rsqrt %110 : vector<2x1xf32>
    %cst_52 = arith.constant dense<0.000000e+00> : vector<2x2xf32>
    %112 = tpu.matmul %100, %100, %cst_52 {dimension_numbers = #tpu.dot_dimension_numbers<[1], [1], [0], [0], [0, 0, 1, 0], [], []>} : vector<2x256xf32>, vector<2x256xf32>, vector<2x2xf32> -> vector<2x2xf32>
    %113 = arith.mulf %112, %7 : vector<2x2xf32>
    %cst_53 = arith.constant dense<0.000000e+00> : vector<2xf32>
    %114 = vector.multi_reduction <add>, %113, %cst_53 [0] : vector<2x2xf32> to vector<2xf32>
    %115 = vector.shape_cast %114 : vector<2xf32> to vector<1x2xf32>
    %cst_54 = arith.constant 0.00392156886 : f32
    %116 = vector.broadcast %cst_54 : f32 to vector<1x2xf32>
    %117 = arith.mulf %115, %116 : vector<1x2xf32>
    %cst_55 = arith.constant 9.99999997E-7 : f32
    %118 = vector.broadcast %cst_55 : f32 to vector<1x2xf32>
    %119 = arith.addf %117, %118 : vector<1x2xf32>
    %120 = math.rsqrt %119 : vector<1x2xf32>
    %c0_56 = arith.constant 0 : index
    %c0_57 = arith.constant 0 : index
    %c0_58 = arith.constant 0 : index
    %121 = vector.load %arg3[%c0_56, %c0_57, %c0_58] : memref<1x2x2xf32, #tpu.memory_space<vmem>>, vector<1x2x2xf32>
    %122 = vector.shape_cast %121 : vector<1x2x2xf32> to vector<2x2xf32>
    %123 = vector.broadcast %111 : vector<2x1xf32> to vector<2x2xf32>
    %124 = vector.broadcast %120 : vector<1x2xf32> to vector<2x2xf32>
    %125 = arith.mulf %123, %124 : vector<2x2xf32>
    %126 = arith.mulf %112, %125 : vector<2x2xf32>
    %127 = arith.addf %122, %126 : vector<2x2xf32>
    %c0_59 = arith.constant 0 : index
    %c0_60 = arith.constant 0 : index
    %c0_61 = arith.constant 0 : index
    %128 = vector.load %arg3[%c0_59, %c0_60, %c0_61] : memref<1x2x2xf32, #tpu.memory_space<vmem>>, vector<1x2x2xf32>
    %129 = vector.shape_cast %128 : vector<1x2x2xf32> to vector<2x2xf32>
    %130 = vector.shape_cast %127 : vector<2x2xf32> to vector<1x2x2xf32>
    tpu.vector_store %arg3[%c0_59, %c0_60, %c0_61], %130 {strides = array<i32>} : memref<1x2x2xf32, #tpu.memory_space<vmem>>, vector<1x2x2xf32>,
    %c0_62 = arith.constant 0 : index
    %c0_63 = arith.constant 0 : index
    %c2 = arith.constant 2 : index
    %131 = vector.load %arg4[%c0_62, %c0_63, %c2] : memref<1x2x4xf32, #tpu.memory_space<vmem>>, vector<1x2x1xf32>
    %132 = vector.shape_cast %131 : vector<1x2x1xf32> to vector<2x1xf32>
    %133 = vector.shape_cast %98 : vector<2x1xf32> to vector<1x2x1xf32>
    tpu.vector_store %arg4[%c0_62, %c0_63, %c2], %133 {strides = array<i32>} : memref<1x2x4xf32, #tpu.memory_space<vmem>>, vector<1x2x1xf32>,
    %c0_64 = arith.constant 0 : index
    %c0_65 = arith.constant 0 : index
    %c2_66 = arith.constant 2 : index
    %134 = vector.load %arg5[%c0_64, %c0_65, %c2_66] : memref<1x2x4xf32, #tpu.memory_space<vmem>>, vector<1x2x1xf32>
    %135 = vector.shape_cast %134 : vector<1x2x1xf32> to vector<2x1xf32>
    %136 = vector.shape_cast %108 : vector<2x1xf32> to vector<1x2x1xf32>
    tpu.vector_store %arg5[%c0_64, %c0_65, %c2_66], %136 {strides = array<i32>} : memref<1x2x4xf32, #tpu.memory_space<vmem>>, vector<1x2x1xf32>,
    %c0_67 = arith.constant 0 : index
    %c768 = arith.constant 768 : index
    %137 = vector.load %arg2[%c0_67, %c768] : memref<2x1024xf32, #tpu.memory_space<vmem>>, vector<2x256xf32>
    %cst_68 = arith.constant dense<0.000000e+00> : vector<2xf32>
    %138 = vector.multi_reduction <add>, %137, %cst_68 [1] : vector<2x256xf32> to vector<2xf32>
    %139 = vector.shape_cast %138 : vector<2xf32> to vector<2x1xf32>
    %cst_69 = arith.constant 2.560000e+02 : f32
    %140 = vector.broadcast %cst_69 : f32 to vector<2x1xf32>
    %141 = arith.divf %139, %140 : vector<2x1xf32>
    %142 = vector.broadcast %141 : vector<2x1xf32> to vector<2x256xf32>
    %143 = arith.subf %137, %142 : vector<2x256xf32>
    %144 = arith.mulf %143, %143 : vector<2x256xf32>
    %cst_70 = arith.constant dense<0.000000e+00> : vector<2xf32>
    %145 = vector.multi_reduction <add>, %144, %cst_70 [1] : vector<2x256xf32> to vector<2xf32>
    %146 = vector.shape_cast %145 : vector<2xf32> to vector<2x1xf32>
    %cst_71 = arith.constant 0.00392156886 : f32
    %147 = vector.broadcast %cst_71 : f32 to vector<2x1xf32>
    %148 = arith.mulf %146, %147 : vector<2x1xf32>
    %cst_72 = arith.constant 9.99999997E-7 : f32
    %149 = vector.broadcast %cst_72 : f32 to vector<2x1xf32>
    %150 = arith.addf %148, %149 : vector<2x1xf32>
    %151 = math.sqrt %150 : vector<2x1xf32>
    %cst_73 = arith.constant 9.99999997E-7 : f32
    %152 = vector.broadcast %cst_73 : f32 to vector<2x1xf32>
    %153 = arith.addf %148, %152 : vector<2x1xf32>
    %154 = math.rsqrt %153 : vector<2x1xf32>
    %cst_74 = arith.constant dense<0.000000e+00> : vector<2x2xf32>
    %155 = tpu.matmul %143, %143, %cst_74 {dimension_numbers = #tpu.dot_dimension_numbers<[1], [1], [0], [0], [0, 0, 1, 0], [], []>} : vector<2x256xf32>, vector<2x256xf32>, vector<2x2xf32> -> vector<2x2xf32>
    %156 = arith.mulf %155, %7 : vector<2x2xf32>
    %cst_75 = arith.constant dense<0.000000e+00> : vector<2xf32>
    %157 = vector.multi_reduction <add>, %156, %cst_75 [0] : vector<2x2xf32> to vector<2xf32>
    %158 = vector.shape_cast %157 : vector<2xf32> to vector<1x2xf32>
    %cst_76 = arith.constant 0.00392156886 : f32
    %159 = vector.broadcast %cst_76 : f32 to vector<1x2xf32>
    %160 = arith.mulf %158, %159 : vector<1x2xf32>
    %cst_77 = arith.constant 9.99999997E-7 : f32
    %161 = vector.broadcast %cst_77 : f32 to vector<1x2xf32>
    %162 = arith.addf %160, %161 : vector<1x2xf32>
    %163 = math.rsqrt %162 : vector<1x2xf32>
    %c0_78 = arith.constant 0 : index
    %c0_79 = arith.constant 0 : index
    %c0_80 = arith.constant 0 : index
    %164 = vector.load %arg3[%c0_78, %c0_79, %c0_80] : memref<1x2x2xf32, #tpu.memory_space<vmem>>, vector<1x2x2xf32>
    %165 = vector.shape_cast %164 : vector<1x2x2xf32> to vector<2x2xf32>
    %166 = vector.broadcast %154 : vector<2x1xf32> to vector<2x2xf32>
    %167 = vector.broadcast %163 : vector<1x2xf32> to vector<2x2xf32>
    %168 = arith.mulf %166, %167 : vector<2x2xf32>
    %169 = arith.mulf %155, %168 : vector<2x2xf32>
    %170 = arith.addf %165, %169 : vector<2x2xf32>
    %c0_81 = arith.constant 0 : index
    %c0_82 = arith.constant 0 : index
    %c0_83 = arith.constant 0 : index
    %171 = vector.load %arg3[%c0_81, %c0_82, %c0_83] : memref<1x2x2xf32, #tpu.memory_space<vmem>>, vector<1x2x2xf32>
    %172 = vector.shape_cast %171 : vector<1x2x2xf32> to vector<2x2xf32>
    %173 = vector.shape_cast %170 : vector<2x2xf32> to vector<1x2x2xf32>
    tpu.vector_store %arg3[%c0_81, %c0_82, %c0_83], %173 {strides = array<i32>} : memref<1x2x2xf32, #tpu.memory_space<vmem>>, vector<1x2x2xf32>,
    %c0_84 = arith.constant 0 : index
    %c0_85 = arith.constant 0 : index
    %c3 = arith.constant 3 : index
    %174 = vector.load %arg4[%c0_84, %c0_85, %c3] : memref<1x2x4xf32, #tpu.memory_space<vmem>>, vector<1x2x1xf32>
    %175 = vector.shape_cast %174 : vector<1x2x1xf32> to vector<2x1xf32>
    %176 = vector.shape_cast %141 : vector<2x1xf32> to vector<1x2x1xf32>
    tpu.vector_store %arg4[%c0_84, %c0_85, %c3], %176 {strides = array<i32>} : memref<1x2x4xf32, #tpu.memory_space<vmem>>, vector<1x2x1xf32>,
    %c0_86 = arith.constant 0 : index
    %c0_87 = arith.constant 0 : index
    %c3_88 = arith.constant 3 : index
    %177 = vector.load %arg5[%c0_86, %c0_87, %c3_88] : memref<1x2x4xf32, #tpu.memory_space<vmem>>, vector<1x2x1xf32>
    %178 = vector.shape_cast %177 : vector<1x2x1xf32> to vector<2x1xf32>
    %179 = vector.shape_cast %151 : vector<2x1xf32> to vector<1x2x1xf32>
    tpu.vector_store %arg5[%c0_86, %c0_87, %c3_88], %179 {strides = array<i32>} : memref<1x2x4xf32, #tpu.memory_space<vmem>>, vector<1x2x1xf32>,
    return
  }
  func.func @transform_0(%arg0: i32, %arg1: i32) -> (i32, i32) {
    %c1_i32 = arith.constant 1 : i32
    %0 = arith.muli %arg0, %c1_i32 : i32
    %1 = arith.addi %0, %arg1 : i32
    %c0_i32 = arith.constant 0 : i32
    %c0_i32_0 = arith.constant 0 : i32
    return %c0_i32, %1 : i32, i32
  }
  func.func @transform_1(%arg0: i32, %arg1: i32) -> (i32, i32, i32) {
    %c0_i32 = arith.constant 0 : i32
    %c0_i32_0 = arith.constant 0 : i32
    %c0_i32_1 = arith.constant 0 : i32
    return %arg0, %c0_i32, %c0_i32_0 : i32, i32, i32
  }
  func.func @transform_2(%arg0: i32, %arg1: i32) -> (i32, i32, i32) {
    %c1_i32 = arith.constant 1 : i32
    %0 = arith.muli %arg0, %c1_i32 : i32
    %1 = arith.addi %0, %arg1 : i32
    %c0_i32 = arith.constant 0 : i32
    %c0_i32_0 = arith.constant 0 : i32
    %c0_i32_1 = arith.constant 0 : i32
    return %1, %c0_i32, %c0_i32_0 : i32, i32, i32
  }
  func.func @transform_3(%arg0: i32, %arg1: i32) -> (i32, i32, i32) {
    %c1_i32 = arith.constant 1 : i32
    %0 = arith.muli %arg0, %c1_i32 : i32
    %1 = arith.addi %0, %arg1 : i32
    %c0_i32 = arith.constant 0 : i32
    %c0_i32_0 = arith.constant 0 : i32
    %c0_i32_1 = arith.constant 0 : i32
    return %1, %c0_i32, %c0_i32_0 : i32, i32, i32
  }
}

module attributes {stable_mosaic.version = 11 : i64} {
  func.func @kernel(%arg0: i32, %arg1: i32, %arg2: memref<1x2x4xf32, #tpu.memory_space<vmem>>, %arg3: memref<1x2x4xf32, #tpu.memory_space<vmem>>, %arg4: memref<2x1024xf32, #tpu.memory_space<vmem>>, %arg5: memref<2x1024xf32, #tpu.memory_space<vmem>>) attributes {dimension_semantics = [#tpu.dimension_semantics<parallel>, #tpu.dimension_semantics<parallel>], iteration_bounds = array<i64: 1, 1>, scalar_prefetch = 0 : i64, scratch_operands = 0 : i64, tpu.core_type = #tpu.core_type<tc>, window_params = [{transform_indices = @transform_0, window_bounds = array<i64: 1, 2, 4>}, {transform_indices = @transform_1, window_bounds = array<i64: 1, 2, 4>}, {transform_indices = @transform_2, window_bounds = array<i64: 2, 1024>}, {transform_indices = @transform_3, window_bounds = array<i64: 2, 1024>}]} {
    %c0 = arith.constant 0 : index
    %c0_0 = arith.constant 0 : index
    %c0_1 = arith.constant 0 : index
    %0 = vector.load %arg2[%c0, %c0_0, %c0_1] : memref<1x2x4xf32, #tpu.memory_space<vmem>>, vector<1x2x1xf32>
    %1 = vector.shape_cast %0 : vector<1x2x1xf32> to vector<2x1xf32>
    %c0_2 = arith.constant 0 : index
    %c0_3 = arith.constant 0 : index
    %c0_4 = arith.constant 0 : index
    %2 = vector.load %arg3[%c0_2, %c0_3, %c0_4] : memref<1x2x4xf32, #tpu.memory_space<vmem>>, vector<1x2x1xf32>
    %3 = vector.shape_cast %2 : vector<1x2x1xf32> to vector<2x1xf32>
    %c0_5 = arith.constant 0 : index
    %c0_6 = arith.constant 0 : index
    %4 = vector.load %arg4[%c0_5, %c0_6] : memref<2x1024xf32, #tpu.memory_space<vmem>>, vector<2x256xf32>
    %5 = vector.broadcast %1 : vector<2x1xf32> to vector<2x256xf32>
    %6 = arith.mulf %4, %5 : vector<2x256xf32>
    %7 = vector.broadcast %3 : vector<2x1xf32> to vector<2x256xf32>
    %8 = arith.addf %6, %7 : vector<2x256xf32>
    %c0_7 = arith.constant 0 : index
    %c0_8 = arith.constant 0 : index
    %9 = vector.load %arg5[%c0_7, %c0_8] : memref<2x1024xf32, #tpu.memory_space<vmem>>, vector<2x256xf32>
    tpu.vector_store %arg5[%c0_7, %c0_8], %8 {strides = array<i32>} : memref<2x1024xf32, #tpu.memory_space<vmem>>, vector<2x256xf32>,
    %c0_9 = arith.constant 0 : index
    %c0_10 = arith.constant 0 : index
    %c1 = arith.constant 1 : index
    %10 = vector.load %arg2[%c0_9, %c0_10, %c1] : memref<1x2x4xf32, #tpu.memory_space<vmem>>, vector<1x2x1xf32>
    %11 = vector.shape_cast %10 : vector<1x2x1xf32> to vector<2x1xf32>
    %c0_11 = arith.constant 0 : index
    %c0_12 = arith.constant 0 : index
    %c1_13 = arith.constant 1 : index
    %12 = vector.load %arg3[%c0_11, %c0_12, %c1_13] : memref<1x2x4xf32, #tpu.memory_space<vmem>>, vector<1x2x1xf32>
    %13 = vector.shape_cast %12 : vector<1x2x1xf32> to vector<2x1xf32>
    %c0_14 = arith.constant 0 : index
    %c256 = arith.constant 256 : index
    %14 = vector.load %arg4[%c0_14, %c256] : memref<2x1024xf32, #tpu.memory_space<vmem>>, vector<2x256xf32>
    %15 = vector.broadcast %11 : vector<2x1xf32> to vector<2x256xf32>
    %16 = arith.mulf %14, %15 : vector<2x256xf32>
    %17 = vector.broadcast %13 : vector<2x1xf32> to vector<2x256xf32>
    %18 = arith.addf %16, %17 : vector<2x256xf32>
    %c0_15 = arith.constant 0 : index
    %c256_16 = arith.constant 256 : index
    %19 = vector.load %arg5[%c0_15, %c256_16] : memref<2x1024xf32, #tpu.memory_space<vmem>>, vector<2x256xf32>
    tpu.vector_store %arg5[%c0_15, %c256_16], %18 {strides = array<i32>} : memref<2x1024xf32, #tpu.memory_space<vmem>>, vector<2x256xf32>,
    %c0_17 = arith.constant 0 : index
    %c0_18 = arith.constant 0 : index
    %c2 = arith.constant 2 : index
    %20 = vector.load %arg2[%c0_17, %c0_18, %c2] : memref<1x2x4xf32, #tpu.memory_space<vmem>>, vector<1x2x1xf32>
    %21 = vector.shape_cast %20 : vector<1x2x1xf32> to vector<2x1xf32>
    %c0_19 = arith.constant 0 : index
    %c0_20 = arith.constant 0 : index
    %c2_21 = arith.constant 2 : index
    %22 = vector.load %arg3[%c0_19, %c0_20, %c2_21] : memref<1x2x4xf32, #tpu.memory_space<vmem>>, vector<1x2x1xf32>
    %23 = vector.shape_cast %22 : vector<1x2x1xf32> to vector<2x1xf32>
    %c0_22 = arith.constant 0 : index
    %c512 = arith.constant 512 : index
    %24 = vector.load %arg4[%c0_22, %c512] : memref<2x1024xf32, #tpu.memory_space<vmem>>, vector<2x256xf32>
    %25 = vector.broadcast %21 : vector<2x1xf32> to vector<2x256xf32>
    %26 = arith.mulf %24, %25 : vector<2x256xf32>
    %27 = vector.broadcast %23 : vector<2x1xf32> to vector<2x256xf32>
    %28 = arith.addf %26, %27 : vector<2x256xf32>
    %c0_23 = arith.constant 0 : index
    %c512_24 = arith.constant 512 : index
    %29 = vector.load %arg5[%c0_23, %c512_24] : memref<2x1024xf32, #tpu.memory_space<vmem>>, vector<2x256xf32>
    tpu.vector_store %arg5[%c0_23, %c512_24], %28 {strides = array<i32>} : memref<2x1024xf32, #tpu.memory_space<vmem>>, vector<2x256xf32>,
    %c0_25 = arith.constant 0 : index
    %c0_26 = arith.constant 0 : index
    %c3 = arith.constant 3 : index
    %30 = vector.load %arg2[%c0_25, %c0_26, %c3] : memref<1x2x4xf32, #tpu.memory_space<vmem>>, vector<1x2x1xf32>
    %31 = vector.shape_cast %30 : vector<1x2x1xf32> to vector<2x1xf32>
    %c0_27 = arith.constant 0 : index
    %c0_28 = arith.constant 0 : index
    %c3_29 = arith.constant 3 : index
    %32 = vector.load %arg3[%c0_27, %c0_28, %c3_29] : memref<1x2x4xf32, #tpu.memory_space<vmem>>, vector<1x2x1xf32>
    %33 = vector.shape_cast %32 : vector<1x2x1xf32> to vector<2x1xf32>
    %c0_30 = arith.constant 0 : index
    %c768 = arith.constant 768 : index
    %34 = vector.load %arg4[%c0_30, %c768] : memref<2x1024xf32, #tpu.memory_space<vmem>>, vector<2x256xf32>
    %35 = vector.broadcast %31 : vector<2x1xf32> to vector<2x256xf32>
    %36 = arith.mulf %34, %35 : vector<2x256xf32>
    %37 = vector.broadcast %33 : vector<2x1xf32> to vector<2x256xf32>
    %38 = arith.addf %36, %37 : vector<2x256xf32>
    %c0_31 = arith.constant 0 : index
    %c768_32 = arith.constant 768 : index
    %39 = vector.load %arg5[%c0_31, %c768_32] : memref<2x1024xf32, #tpu.memory_space<vmem>>, vector<2x256xf32>
    tpu.vector_store %arg5[%c0_31, %c768_32], %38 {strides = array<i32>} : memref<2x1024xf32, #tpu.memory_space<vmem>>, vector<2x256xf32>,
    return
  }
  func.func @transform_0(%arg0: i32, %arg1: i32) -> (i32, i32, i32) {
    %c0_i32 = arith.constant 0 : i32
    %c0_i32_0 = arith.constant 0 : i32
    %c0_i32_1 = arith.constant 0 : i32
    return %arg0, %c0_i32, %c0_i32_0 : i32, i32, i32
  }
  func.func @transform_1(%arg0: i32, %arg1: i32) -> (i32, i32, i32) {
    %c0_i32 = arith.constant 0 : i32
    %c0_i32_0 = arith.constant 0 : i32
    %c0_i32_1 = arith.constant 0 : i32
    return %arg0, %c0_i32, %c0_i32_0 : i32, i32, i32
  }
  func.func @transform_2(%arg0: i32, %arg1: i32) -> (i32, i32) {
    %c1_i32 = arith.constant 1 : i32
    %0 = arith.muli %arg0, %c1_i32 : i32
    %1 = arith.addi %0, %arg1 : i32
    %c0_i32 = arith.constant 0 : i32
    %c0_i32_0 = arith.constant 0 : i32
    return %c0_i32, %1 : i32, i32
  }
  func.func @transform_3(%arg0: i32, %arg1: i32) -> (i32, i32) {
    %c1_i32 = arith.constant 1 : i32
    %0 = arith.muli %arg0, %c1_i32 : i32
    %1 = arith.addi %0, %arg1 : i32
    %c0_i32 = arith.constant 0 : i32
    %c0_i32_0 = arith.constant 0 : i32
    return %c0_i32, %1 : i32, i32
  }
}

</mosaic_0001>

<bundles_post_ra>
// kernel: fusestyle.3
= control target key start
LH: loop header
LB: loop body
LE: loop exit
PB: predicated region body
PF: predicated region fallthrough
CT: control target
= control target key end

     0   :  { %v214_v0 = vmov 2   ;;  %v215_v1 = vmov 0   ;;  %v216_v6 = vmov 3   ;;  %v217_v7 = vmov 1   ;;  %s287_s0 = inlined_call_operand.vmem [shape: f32[1,2,4], index: 0, kind: input, shape index: {}]   ;;  %s288_s1 = inlined_call_operand.vmem [shape: f32[1,2,4], index: 1, kind: input, shape index: {}]   ;;  %s289_s2 = inlined_call_operand.vmem [shape: f32[2,1024], index: 2, kind: input, shape index: {}]   ;;  %s290_s3 = inlined_call_operand.vmem [shape: f32[2,1024], index: 3, kind: output, shape index: {}]  }
   0x1   :  { %209 = vset.pattern.permute.xlu1 %v214_v0  ;;  %207 = vset.pattern.permute.xlu0 %v215_v1  ;;  %v110_v2 = vld [vmem:[%s287_s0] sm:$0x3]  ;;  %v218_v12 = vmov 269488144   ;;  %v60_v14 = vlaneseq  ;;  %v82_v21 = vld [vmem:[%s289_s2 + $0x4] sm:$0xf] }
   0x2   :  { %v50_v3 = vld [vmem:[%s287_s0] sm:$0x3]  ;;  %115 = vperm.xlu1 %209, %v110_v2   ;;  %v58_v13 = vunpack.c.l.s4 %v218_v12  ;;  %v142_v34 = vld [vmem:[%s289_s2 + $0xc] sm:$0xf]  ;;  %v112_v36 = vld [vmem:[%s289_s2 + $0x8] sm:$0xf] }
   0x3   :  { %55 = vperm.xlu0 %207, %v50_v3   ;;  %v140_v4 = vld [vmem:[%s287_s0] sm:$0x3]  ;;  %v61_v16 = vshrl.u32 %v60_v14, 7 }
   0x4   :  { %v80_v5 = vld [vmem:[%s287_s0] sm:$0x3]  ;;  %v59_v15 = vunpack.c.0.s8 %v58_v13 }
   0x5   :  { %v81_v8 = vld [vmem:[%s288_s1] sm:$0x3] }
   0x6   :  { %210 = vset.pattern.permute.xlu1 %v216_v6  ;;  %v51_v9 = vld [vmem:[%s288_s1] sm:$0x3]  ;;  %v62_v19 = vsub.s32 %v59_v15, %v61_v16 }
   0x7   :  { %208 = vset.pattern.permute.xlu0 %v217_v7  ;;  %145 = vperm.xlu1 %210, %v140_v4   ;;  %v141_v10 = vld [vmem:[%s288_s1] sm:$0x3] }
   0x8   :  { %85 = vperm.xlu0 %208, %v80_v5   ;;  %v111_v11 = vld [vmem:[%s288_s1] sm:$0x3] }
   0x9   :  { %v52_v25 = vld [vmem:[%s289_s2] sm:$0xf] }
   0xb   :  { %211 = vset.pattern.permute.xlu1 %v215_v1 }
   0xc   :  { %98 = vperm.xlu0 %208, %v81_v8   ;;  %68 = vperm.xlu1 %211, %v51_v9  }
  0x10   :  { %213 = vset.pattern.permute.xlu0 %v216_v6  ;;  %212 = vset.pattern.permute.xlu1 %v214_v0 }
  0x11   :  { %158 = vperm.xlu0 %213, %v141_v10   ;;  %128 = vperm.xlu1 %212, %v111_v11  }
  0x81   :  { %v116_v17 = vpop.permute.xlu1 %115 }
  0x82   :  { %v56_v18 = vpop.permute.xlu0 %55  ;;  %v123_v33 = vrot.slane %v116_v17, %v62_v19 }
  0x83   :  { %v63_v24 = vrot.slane %v56_v18, %v62_v19 }
  0x84   :  { %v125_v42 = vmul.f32 %v123_v33, %v112_v36 }
  0x85   :  { %v65_v30 = vmul.f32 %v63_v24, %v52_v25 }
  0x86   :  { %v146_v20 = vpop.permute.xlu1 %145 }
  0x87   :  { %v86_v22 = vpop.permute.xlu0 %85  ;;  %v153_v31 = vrot.slane %v146_v20, %v62_v19 }
  0x88   :  { %v93_v23 = vrot.slane %v86_v22, %v62_v19 }
  0x89   :  { %v155_v39 = vmul.f32 %v153_v31, %v142_v34 }
  0x8a   :  { %v95_v26 = vmul.f32 %v93_v23, %v82_v21 }
  0x8b   :  { %v99_v27 = vpop.permute.xlu0 %98  ;;  %v69_v29 = vpop.permute.xlu1 %68 }
  0x8c   :  { %v106_v28 = vrot.slane %v99_v27, %v62_v19  ;;  %v76_v32 = vrot.slane %v69_v29, %v62_v19 }
  0x8e   :  { %v108_v35 = vadd.f32 %v106_v28, %v95_v26  ;;  %v78_v37 = vadd.f32 %v76_v32, %v65_v30 }
  0x90   :  { %109 = vst [vmem:[%s290_s3 + $0x4] sm:$0xf] %v108_v35  ;;  %v159_v38 = vpop.permute.xlu0 %158  ;;  %79 = vst [vmem:[%s290_s3] sm:$0xf] %v78_v37  ;;  %v129_v41 = vpop.permute.xlu1 %128 }
  0x91   :  { %v166_v40 = vrot.slane %v159_v38, %v62_v19  ;;  %v136_v43 = vrot.slane %v129_v41, %v62_v19 }
  0x93   :  { %v168_v44 = vadd.f32 %v166_v40, %v155_v39  ;;  %v138_v45 = vadd.f32 %v136_v43, %v125_v42 }
  0x95   :  { %169 = vst [vmem:[%s290_s3 + $0xc] sm:$0xf] %v168_v44  ;;  %139 = vst [vmem:[%s290_s3 + $0x8] sm:$0xf] %v138_v45 }

// kernel: fusestyle.2
= control target key start
LH: loop header
LB: loop body
LE: loop exit
PB: predicated region body
PF: predicated region fallthrough
CT: control target
= control target key end

     0   :  { %v61_v0 = vlaneseq  ;;  %v767_v1 = vmov 1983009808   ;;  %vm80_vm0 = vcmask 1041408   ;;  %v768_v30 = vmov 269488144   ;;  %s924_s0 = inlined_call_operand.vmem [shape: f32[2,1024], index: 0, kind: input, shape index: {}]   ;;  %s925_s2 = inlined_call_operand.vmem [shape: f32[1,2,4], index: 2, kind: output, shape index: {1}]   ;;  %s926_s1 = inlined_call_operand.vmem [shape: f32[1,2,2], index: 1, kind: output, shape index: {0}]   ;;  %s927_s3 = inlined_call_operand.vmem [shape: f32[1,2,4], index: 3, kind: output, shape index: {2}]  }
   0x1   :  { %v71_v2 = vunpack.c.l.s4 %v767_v1  ;;  %v68_v4 = vld [vmem:[%s924_s0] sm:$0xf]  ;;  %v381_v6 = vld [vmem:[%s924_s0 + $0x8] sm:$0xf]  ;;  %v226_v7 = vld [vmem:[%s924_s0 + $0x4] sm:$0xf]  ;;  %v90_v31 = vunpack.c.l.s4 %v768_v30 }
   0x2   :  { %v791_v3 = vshrl.u32 %v61_v0, 7  ;;  %v536_v8 = vld [vmem:[%s924_s0 + $0xc] sm:$0xf]  ;;  %vm223_vm1 = vcmask 1024   ;;  %vm378_vm2 = vcmask 9224   ;;  %vm533_vm3 = vcmask 17424  }
   0x3   :  { %v72_v5 = vunpack.c.0.s8 %v71_v2  ;;  %v91_v32 = vunpack.c.0.s8 %v90_v31  ;;  %vm688_vm4 = vcmask 25624   ;;  %vm59_vm5 = vcmask 9216  }
   0x5   :  { %v806_v9 = vsub.s32 %v72_v5, %v791_v3  ;;  %v94_v33 = vsub.s32 %v91_v32, %v791_v3 }
   0x7   :  { %v76_v10 = vrot.slane %v68_v4, %v806_v9  ;;  %v389_v11 = vrot.slane %v381_v6, %v806_v9  ;;  %v234_v12 = vrot.slane %v226_v7, %v806_v9  ;;  %v544_v13 = vrot.slane %v536_v8, %v806_v9 }
   0x9   :  { %v77_v14 = vcombine.high %v76_v10, %v76_v10  ;;  %v81_v15 = vsel %vm80_vm0, %v76_v10, 0.0  ;;  %v390_v16 = vcombine.high %v389_v11, %v389_v11  ;;  %v393_v17 = vsel %vm80_vm0, %v389_v11, 0.0 }
   0xa   :  { %v235_v18 = vcombine.high %v234_v12, %v234_v12  ;;  %v545_v19 = vcombine.high %v544_v13, %v544_v13  ;;  %v238_v22 = vsel %vm80_vm0, %v234_v12, 0.0  ;;  %v548_v23 = vsel %vm80_vm0, %v544_v13, 0.0 }
   0xb   :  { %v82_v20 = vsel %vm80_vm0, %v77_v14, 0.0  ;;  %v394_v21 = vsel %vm80_vm0, %v390_v16, 0.0 }
   0xc   :  { %v83_v24 = vadd.f32 %v82_v20, %v81_v15  ;;  %v395_v25 = vadd.f32 %v394_v21, %v393_v17  ;;  %v239_v26 = vsel %vm80_vm0, %v235_v18, 0.0  ;;  %v549_v27 = vsel %vm80_vm0, %v545_v19, 0.0 }
   0xd   :  { %v240_v28 = vadd.f32 %v239_v26, %v238_v22  ;;  %v550_v29 = vadd.f32 %v549_v27, %v548_v23  ;;  %v769_v20 = vmov 0.0  }
   0xe   :  { %84 = vadd.xlane.f32.xlu0 %v83_v24  ;;  %396 = vadd.xlane.f32.xlu1 %v395_v25  ;;  %60 = vst.msk [vmem:[%s926_s1] sm:$0x3] %vm59_vm5, %v769_v20 }
  0x12   :  { %241 = vadd.xlane.f32.xlu0 %v240_v28  ;;  %551 = vadd.xlane.f32.xlu1 %v550_v29 }
  0x9b   :  { %v85_v34 = vpop.xlane.xlu0 %84  ;;  %v397_v35 = vpop.xlane.xlu1 %396 }
  0x9c   :  { %v87_v36 = vmul.f32 0.00390625, %v85_v34  ;;  %v398_v37 = vmul.f32 0.00390625, %v397_v35 }
  0x9e   :  { %v95_v38 = vrot.slane %v87_v36, %v94_v33  ;;  %224 = vst.msk [vmem:[%s925_s2] sm:$0x3] %vm223_vm1, %v87_v36  ;;  %v406_v39 = vrot.slane %v398_v37, %v94_v33 }
  0x9f   :  { %v242_v40 = vpop.xlane.xlu0 %241  ;;  %v552_v41 = vpop.xlane.xlu1 %551 }
  0xa0   :  { %v97_v42 = vsub.f32 %v68_v4, %v95_v38  ;;  %v408_v43 = vsub.f32 %v381_v6, %v406_v39  ;;  %v243_v44 = vmul.f32 0.00390625, %v242_v40  ;;  %v553_v45 = vmul.f32 0.00390625, %v552_v41 }
  0xa2   :  { %v443_v46 = vrot.slane %v408_v43, %v806_v9  ;;  %v251_v47 = vrot.slane %v243_v44, %v94_v33  ;;  %379 = vst.msk [vmem:[%s925_s2] sm:$0x3] %vm378_vm2, %v243_v44  ;;  %v561_v48 = vrot.slane %v553_v45, %v94_v33  ;;  %v132_v49 = vrot.slane %v97_v42, %v806_v9 }
  0xa3   :  { %534 = vst.msk [vmem:[%s925_s2] sm:$0x3] %vm533_vm3, %v398_v37  ;;  %v98_v50 = vmul.f32 %v97_v42, %v97_v42  ;;  %v409_v51 = vmul.f32 %v408_v43, %v408_v43 }
  0xa4   :  { %v253_v52 = vsub.f32 %v226_v7, %v251_v47  ;;  %v563_v53 = vsub.f32 %v536_v8, %v561_v48  ;;  %689 = vst.msk [vmem:[%s925_s2] sm:$0x3] %vm688_vm4, %v553_v45  ;;  %v133_v54 = vcombine.high %v132_v49, %v132_v49  ;;  %v444_v55 = vcombine.high %v443_v46, %v443_v46 }
  0xa5   :  { %v106_v56 = vrot.slane %v98_v50, %v806_v9  ;;  %v417_v57 = vrot.slane %v409_v51, %v806_v9 }
  0xa6   :  { %v598_v58 = vrot.slane %v563_v53, %v806_v9  ;;  %136 = vmatprep.subr.mxu0 %v133_v54  ;;  %200 = vmatprep.mubr.f32.mxu0 %v133_v54  ;;  %v288_v59 = vrot.slane %v253_v52, %v806_v9  ;;  %v254_v60 = vmul.f32 %v253_v52, %v253_v52 }
  0xa7   :  { %137 = vmatpush1.xpose.msra.mxu0 %v132_v49  ;;  %v107_v61 = vcombine.high %v106_v56, %v106_v56  ;;  %v418_v62 = vcombine.high %v417_v57, %v417_v57  ;;  %v110_v1 = vsel %vm80_vm0, %v106_v56, 0.0  ;;  %v564_v4 = vmul.f32 %v563_v53, %v563_v53 }
  0xa8   :  { %v289_v63 = vcombine.high %v288_v59, %v288_v59  ;;  %447 = vmatprep.subr.mxu0 %v444_v55  ;;  %v262_v2 = vrot.slane %v254_v60, %v806_v9  ;;  %v599_v6 = vcombine.high %v598_v58, %v598_v58  ;;  %v421_v7 = vsel %vm80_vm0, %v417_v57, 0.0 }
  0xa9   :  { %v111_v5 = vsel %vm80_vm0, %v107_v61, 0.0  ;;  %v422_v8 = vsel %vm80_vm0, %v418_v62, 0.0  ;;  %v572_v13 = vrot.slane %v564_v4, %v806_v9  ;;  %v64_v53 = vand.u32 127, %v61_v0 }
  0xaa   :  { %201 = vmatmul.mubr.f32.vlgmr.msra.gmra.mrb[0].mxu0 %v132_v49  ;;  %292 = vmatprep.subr.mxu1 %v289_v63  ;;  %v112_v10 = vadd.f32 %v111_v5, %v110_v1  ;;  %v263_v11 = vcombine.high %v262_v2, %v262_v2  ;;  %v266_v12 = vsel %vm80_vm0, %v262_v2, 0.0  ;;  %v423_v14 = vadd.f32 %v422_v8, %v421_v7 }
  0xab   :  { %448 = vmatpush1.xpose.msra.mxu0 %v443_v46  ;;  %293 = vmatpush1.xpose.msra.mxu1 %v288_v59  ;;  %v573_v17 = vcombine.high %v572_v13, %v572_v13  ;;  %v576_v18 = vsel %vm80_vm0, %v572_v13, 0.0  ;;  %vm65_vm14 = vcmp.eq.s32.totalorder %v791_v3, %v64_v53 }
  0xac   :  { %113 = vadd.xlane.f32.xlu0 %v112_v10  ;;  %356 = vmatprep.mubr.f32.mxu1 %v289_v63  ;;  %v267_v15 = vsel %vm80_vm0, %v263_v11, 0.0  ;;  %v747_v54 = vsel %vm65_vm14, 1.0, %v769_v20 }
  0xad   :  { %511 = vmatprep.mubr.f32.mxu0 %v444_v55  ;;  %602 = vmatprep.subr.mxu1 %v599_v6  ;;  %v268_v16 = vadd.f32 %v267_v15, %v266_v12  ;;  %v577_v19 = vsel %vm80_vm0, %v573_v17, 0.0 }
  0xae   :  { %357 = vmatmul.mubr.f32.vlgmr.msra.gmra.mrb[0].mxu1 %v288_v59  ;;  %512 = vmatmul.mubr.f32.vlgmr.msra.gmra.mrb[2].mxu0 %v443_v46  ;;  %v578_v9 = vadd.f32 %v577_v19, %v576_v18 }
  0xaf   :  { %603 = vmatpush1.xpose.msra.mxu1 %v598_v58  ;;  %269 = vadd.xlane.f32.xlu1 %v268_v16 }
  0xb0   :  { %424 = vadd.xlane.f32.xlu0 %v423_v14  ;;  %666 = vmatprep.mubr.f32.mxu1 %v599_v6 }
  0xb2   :  { %667 = vmatmul.mubr.f32.vlgmr.msra.gmra.mrb[2].mxu1 %v598_v58 }
  0xb3   :  { %579 = vadd.xlane.f32.xlu1 %v578_v9 }
 0x139   :  { %v114_v21 = vpop.xlane.xlu0 %113 }
 0x13a   :  { %v115_v22 = vmul.f32 0.003921569, %v114_v21 }
 0x13c   :  { %v116_v23 = vadd.f32 1e-06, %v115_v22  ;;  %v270_v24 = vpop.xlane.xlu1 %269 }
 0x13d   :  { %v271_v25 = vmul.f32 0.003921569, %v270_v24  ;;  %v425_v26 = vpop.xlane.xlu0 %424 }
 0x13e   :  { %v426_v27 = vmul.f32 0.003921569, %v425_v26  ;;  %751 = vrsqrt.f32 %v116_v23  ;;  %vm119_vm6 = vcmp.eq.f32.partialorder %v116_v23, inf  ;;  %v122_v35 = vand.u32 2147483648, %v116_v23 }
 0x13f   :  { %v272_v28 = vadd.f32 1e-06, %v271_v25  ;;  %vm121_vm7 = vcmp.eq.f32.partialorder %v116_v23, 0.0 }
 0x140   :  { %v427_v29 = vadd.f32 1e-06, %v426_v27  ;;  %v580_v30 = vpop.xlane.xlu1 %579 }
 0x141   :  { %v581_v31 = vmul.f32 0.003921569, %v580_v30  ;;  %753 = vrsqrt.f32 %v272_v28  ;;  %vm275_vm9 = vcmp.eq.f32.partialorder %v272_v28, inf  ;;  %v278_v42 = vand.u32 2147483648, %v272_v28 }
 0x142   :  { %755 = vrsqrt.f32 %v427_v29  ;;  %vm430_vm8 = vcmp.eq.f32.partialorder %v427_v29, inf  ;;  %v433_v39 = vand.u32 2147483648, %v427_v29  ;;  %vm432_vm10 = vcmp.eq.f32.partialorder %v427_v29, 0.0 }
 0x143   :  { %v582_v32 = vadd.f32 1e-06, %v581_v31  ;;  %vm277_vm11 = vcmp.eq.f32.partialorder %v272_v28, 0.0 }
 0x145   :  { %757 = vrsqrt.f32 %v582_v32  ;;  %vm585_vm12 = vcmp.eq.f32.partialorder %v582_v32, inf  ;;  %v588_v45 = vand.u32 2147483648, %v582_v32  ;;  %vm587_vm13 = vcmp.eq.f32.partialorder %v582_v32, 0.0 }
 0x148   :  { %v857_v33 = vpop.eup %751 }
 0x149   :  { %v118_v34 = vmul.f32 %v857_v33, %v116_v23 }
 0x14b   :  { %v860_v36 = vpop.eup %753  ;;  %v120_v37 = vsel %vm119_vm6, %v116_v23, %v118_v34 }
 0x14c   :  { %v862_v38 = vpop.eup %755  ;;  %v123_v40 = vsel %vm121_vm7, %v122_v35, %v120_v37  ;;  %v274_v41 = vmul.f32 %v860_v36, %v272_v28 }
 0x14d   :  { %225 = vst.msk [vmem:[%s927_s3] sm:$0x3] %vm223_vm1, %v123_v40  ;;  %v429_v43 = vmul.f32 %v862_v38, %v427_v29 }
 0x14e   :  { %v276_v46 = vsel %vm275_vm9, %v272_v28, %v274_v41 }
 0x14f   :  { %v870_v44 = vpop.eup %757  ;;  %v279_v47 = vsel %vm277_vm11, %v278_v42, %v276_v46  ;;  %v431_v48 = vsel %vm430_vm8, %v427_v29, %v429_v43 }
 0x150   :  { %v584_v49 = vmul.f32 %v870_v44, %v582_v32  ;;  %380 = vst.msk [vmem:[%s927_s3] sm:$0x3] %vm378_vm2, %v279_v47  ;;  %v434_v50 = vsel %vm432_vm10, %v433_v39, %v431_v48 }
 0x151   :  { %535 = vst.msk [vmem:[%s927_s3] sm:$0x3] %vm533_vm3, %v434_v50 }
 0x152   :  { %v586_v51 = vsel %vm585_vm12, %v582_v32, %v584_v49 }
 0x153   :  { %v589_v52 = vsel %vm587_vm13, %v588_v45, %v586_v51  ;;  %v218_v45 = vld [vmem:[%s926_s1] sm:$0x3] }
 0x154   :  { %690 = vst.msk [vmem:[%s927_s3] sm:$0x3] %vm688_vm4, %v589_v52 }
 0x17d   :  { %v202_v55 = vpop.f32.mrb[0].mxu0 }
 0x17e   :  { %v206_v56 = vmul.f32 %v747_v54, %v202_v55  ;;  %v204_v57 = vpop.f32.mrb[1].mxu0 }
 0x180   :  { %v208_v58 = vsel %vm59_vm5, %v206_v56, 0.0 }
 0x181   :  { %v209_v59 = vrot.slane %v208_v58, 4  ;;  %v358_v60 = vpop.f32.mrb[0].mxu1  ;;  %v513_v61 = vpop.f32.mrb[2].mxu0 }
 0x182   :  { %v362_v62 = vmul.f32 %v747_v54, %v358_v60  ;;  %v517_v63 = vmul.f32 %v747_v54, %v513_v61  ;;  %v360_v1 = vpop.f32.mrb[1].mxu1  ;;  %v515_v2 = vpop.f32.mrb[3].mxu0 }
 0x183   :  { %v210_v4 = vadd.f32 %v209_v59, %v208_v58 }
 0x184   :  { %v363_v5 = vsel %vm59_vm5, %v362_v62, 0.0  ;;  %v518_v0 = vsel %vm59_vm5, %v517_v63, 0.0 }
 0x185   :  { %v211_v6 = vrot.slane %v210_v4, 2  ;;  %v364_v3 = vrot.slane %v363_v5, 4  ;;  %v519_v7 = vrot.slane %v518_v0, 4  ;;  %v668_v8 = vpop.f32.mrb[2].mxu1 }
 0x186   :  { %v672_v10 = vmul.f32 %v747_v54, %v668_v8  ;;  %v670_v11 = vpop.f32.mrb[3].mxu1 }
 0x187   :  { %v212_v12 = vadd.f32 %v211_v6, %v210_v4  ;;  %v365_v13 = vadd.f32 %v364_v3, %v363_v5  ;;  %v520_v14 = vadd.f32 %v519_v7, %v518_v0 }
 0x188   :  { %v673_v15 = vsel %vm59_vm5, %v672_v10, 0.0 }
 0x189   :  { %v213_v16 = vrot.slane %v212_v12, 1  ;;  %v366_v17 = vrot.slane %v365_v13, 2  ;;  %v521_v18 = vrot.slane %v520_v14, 2  ;;  %v674_v19 = vrot.slane %v673_v15, 4 }
 0x18b   :  { %v214_v9 = vadd.f32 %v213_v16, %v212_v12  ;;  %v367_v20 = vadd.f32 %v366_v17, %v365_v13  ;;  %v522_v21 = vadd.f32 %v521_v18, %v520_v14  ;;  %v675_v22 = vadd.f32 %v674_v19, %v673_v15 }
 0x18d   :  { %v215_v23 = vmul.f32 0.003921569, %v214_v9  ;;  %v368_v24 = vrot.slane %v367_v20, 1  ;;  %v523_v25 = vrot.slane %v522_v21, 1  ;;  %v676_v26 = vrot.slane %v675_v22, 2 }
 0x18f   :  { %v216_v27 = vadd.f32 1e-06, %v215_v23  ;;  %v369_v28 = vadd.f32 %v368_v24, %v367_v20  ;;  %v524_v29 = vadd.f32 %v523_v25, %v522_v21  ;;  %v677_v30 = vadd.f32 %v676_v26, %v675_v22 }
 0x191   :  { %759 = vrsqrt.f32 %v216_v27  ;;  %v370_v31 = vmul.f32 0.003921569, %v369_v28  ;;  %v525_v32 = vmul.f32 0.003921569, %v524_v29  ;;  %v678_v34 = vrot.slane %v677_v30, 1 }
 0x193   :  { %v371_v35 = vadd.f32 1e-06, %v370_v31  ;;  %v526_v37 = vadd.f32 1e-06, %v525_v32  ;;  %v679_v39 = vadd.f32 %v678_v34, %v677_v30 }
 0x195   :  { %761 = vrsqrt.f32 %v371_v35  ;;  %v680_v40 = vmul.f32 0.003921569, %v679_v39 }
 0x196   :  { %763 = vrsqrt.f32 %v526_v37 }
 0x197   :  { %v681_v41 = vadd.f32 1e-06, %v680_v40 }
 0x199   :  { %765 = vrsqrt.f32 %v681_v41 }
 0x19b   :  { %v760_v42 = vpop.eup %759 }
 0x19c   :  { %v219_v43 = vmul.f32 %v760_v42, %v857_v33 }
 0x19e   :  { %v220_v46 = vmul.f32 %v219_v43, %v202_v55 }
 0x19f   :  { %v762_v47 = vpop.eup %761 }
 0x1a0   :  { %v764_v48 = vpop.eup %763  ;;  %v221_v49 = vadd.f32 %v220_v46, %v218_v45  ;;  %v374_v50 = vmul.f32 %v762_v47, %v860_v36 }
 0x1a1   :  { %v529_v51 = vmul.f32 %v764_v48, %v862_v38 }
 0x1a2   :  { %222 = vst.msk [vmem:[%s926_s1] sm:$0x3] %vm59_vm5, %v221_v49  ;;  %v375_v52 = vmul.f32 %v374_v50, %v358_v60 }
 0x1a3   :  { %v766_v53 = vpop.eup %765  ;;  %v530_v33 = vmul.f32 %v529_v51, %v513_v61 }
 0x1a4   :  { %v684_v54 = vmul.f32 %v766_v53, %v870_v44 }
 0x1a6   :  { %v685_v56 = vmul.f32 %v684_v54, %v668_v8 }
 0x1a9   :  { %v373_v55 = vld [vmem:[%s926_s1] sm:$0x3] }
 0x1aa   :  { %v376_v57 = vadd.f32 %v375_v52, %v373_v55 }
 0x1ac   :  { %377 = vst.msk [vmem:[%s926_s1] sm:$0x3] %vm59_vm5, %v376_v57 }
 0x1b3   :  { %v528_v36 = vld [vmem:[%s926_s1] sm:$0x3] }
 0x1b4   :  { %v531_v38 = vadd.f32 %v530_v33, %v528_v36 }
 0x1b6   :  { %532 = vst.msk [vmem:[%s926_s1] sm:$0x3] %vm59_vm5, %v531_v38 }
 0x1bd   :  { %v683_v44 = vld [vmem:[%s926_s1] sm:$0x3] }
 0x1be   :  { %v686_v58 = vadd.f32 %v685_v56, %v683_v44 }
 0x1c0   :  { %687 = vst.msk [vmem:[%s926_s1] sm:$0x3] %vm59_vm5, %v686_v58 }

</bundles_post_ra>
